<compile_context>
chip_gen: v7x
topology: tpu7x:2x2x1
jax: 0.10.0
libtpu: 0.0.40
codegen_flags: <defaults>
</compile_context>

<pallas_src>
import jax
import jax.numpy as jnp
from jax.experimental import pallas as pl
from jax.experimental.pallas import tpu as pltpu


def cf_kernel(uid_ref, iid_ref, u_tab_ref, i_tab_ref, out_ref,
              u_rows_ref, i_rows_ref):
    # uid_ref / iid_ref   : SMEM scalar-prefetch refs, shape (B_pad,), int32.
    # u_tab_ref / i_tab_ref: full VMEM-resident embedding tables (rows, D).
    # out_ref             : (1, TB) lane-dense ratings block, float32.
    # u_rows_ref/i_rows_ref: (TB, D) VMEM scratch holding the gathered rows.
    tb = out_ref.shape[1]
    base = pl.program_id(0) * tb

    def gather_row(t, carry):
        uid = uid_ref[base + t]
        iid = iid_ref[base + t]
        u_rows_ref[pl.ds(t, 1), :] = u_tab_ref[pl.ds(uid, 1), :]
        i_rows_ref[pl.ds(t, 1), :] = i_tab_ref[pl.ds(iid, 1), :]
        return carry

    jax.lax.fori_loop(0, tb, gather_row, 0)

    # One vectorized multiply over the whole block, transpose once so the final
    # reduction is a sublane reduce whose result is naturally lane-dense (1, TB).
    prod = u_rows_ref[...].astype(jnp.float32) * i_rows_ref[...].astype(jnp.float32)
    out_ref[...] = jnp.sum(jnp.transpose(prod), axis=0, keepdims=True)


def cf_forward(user_ids, item_ids, user_emb, item_emb, *, tb=256):
    """Pallas equivalent of CFModel.forward: (E_u[user_ids] * E_i[item_ids]).sum(-1)."""
    B = user_ids.shape[0]
    num_users, D = user_emb.shape
    num_items, _ = item_emb.shape

    num_blocks = pl.cdiv(B, tb)
    b_pad = num_blocks * tb
    pad = b_pad - B

    # PyTorch nn.Embedding raises on out-of-range ids; we cannot raise in-kernel,
    # so clamp to a valid row (avoids OOB dynamic VMEM indexing) and pad to a
    # whole block with row 0 (padded results are sliced away below).
    uids = jnp.pad(jnp.clip(user_ids.astype(jnp.int32), 0, num_users - 1), (0, pad))
    iids = jnp.pad(jnp.clip(item_ids.astype(jnp.int32), 0, num_items - 1), (0, pad))

    grid_spec = pltpu.PrefetchScalarGridSpec(
        num_scalar_prefetch=2,            # uids, iids land in SMEM
        grid=(num_blocks,),               # one grid step per TB batch elements
        in_specs=[
            # Full-extent, constant-index blocks: tables stay resident in VMEM.
            pl.BlockSpec((num_users, D), lambda b, uids, iids: (0, 0)),
            pl.BlockSpec((num_items, D), lambda b, uids, iids: (0, 0)),
        ],
        out_specs=pl.BlockSpec((1, tb), lambda b, uids, iids: (b, 0)),
        scratch_shapes=[
            pltpu.VMEM((tb, D), user_emb.dtype),
            pltpu.VMEM((tb, D), item_emb.dtype),
        ],
    )

    out = pl.pallas_call(
        cf_kernel,
        out_shape=jax.ShapeDtypeStruct((num_blocks, tb), jnp.float32),
        grid_spec=grid_spec,
        compiler_params=pltpu.CompilerParams(
            dimension_semantics=("parallel",)),
    )(uids, iids, user_emb, item_emb)

    return out.reshape(-1)[:B]            # ratings: shape (B,), float32


if __name__ == "__main__":
    num_users, num_items, embedding_dim = 32, 64, 128
    batch = 8

    key = jax.random.PRNGKey(0)
    k_u, k_i, k_uid, k_iid = jax.random.split(key, 4)

    # Deterministic synthetic parameters (nn.Embedding weights ~ N(0,1) by default).
    user_emb = jax.random.normal(k_u, (num_users, embedding_dim), dtype=jnp.float32)
    item_emb = jax.random.normal(k_i, (num_items, embedding_dim), dtype=jnp.float32)

    user_ids = jax.random.randint(k_uid, (batch,), 0, num_users, dtype=jnp.int32)
    item_ids = jax.random.randint(k_iid, (batch,), 0, num_items, dtype=jnp.int32)

    ratings = cf_forward(user_ids, item_ids, user_emb, item_emb)
    ratings = jax.block_until_ready(ratings)

    # Pure-JAX reference for correctness.
    ref = jnp.sum(user_emb[user_ids] * item_emb[item_ids], axis=1)
    assert ratings.shape == (batch,)
    assert jnp.allclose(ratings, ref, atol=1e-4, rtol=1e-5), (ratings, ref)

    print("KERNEL_OK")
</pallas_src>

<mosaic_0001>
module attributes {stable_mosaic.version = 11 : i64} {
  func.func @cf_kernel(%arg0: i32, %arg1: memref<256xi32, #tpu.memory_space<smem>>, %arg2: memref<256xi32, #tpu.memory_space<smem>>, %arg3: memref<32x128xf32, #tpu.memory_space<vmem>>, %arg4: memref<64x128xf32, #tpu.memory_space<vmem>>, %arg5: memref<1x256xf32, #tpu.memory_space<vmem>>, %arg6: memref<256x128xf32, #tpu.memory_space<vmem>>, %arg7: memref<256x128xf32, #tpu.memory_space<vmem>>) attributes {dimension_semantics = [#tpu.dimension_semantics<parallel>], iteration_bounds = array<i64: 1>, scalar_prefetch = 2 : i64, scratch_operands = 2 : i64, tpu.core_type = #tpu.core_type<tc>, window_params = [{pipeline_mode = #tpu.pipeline_mode<synchronous>, transform_indices = @transform_0, window_bounds = array<i64: 32, 128>}, {pipeline_mode = #tpu.pipeline_mode<synchronous>, transform_indices = @transform_1, window_bounds = array<i64: 64, 128>}, {transform_indices = @transform_2, window_bounds = array<i64: 1, 256>}]} {
    %c256_i32 = arith.constant 256 : i32
    %0 = arith.muli %arg0, %c256_i32 : i32
    %c0_i32 = arith.constant 0 : i32
    %c256_i32_0 = arith.constant 256 : i32
    %1 = arith.addi %c0_i32, %c256_i32_0 : i32
    %c1_i32 = arith.constant 1 : i32
    scf.for %arg8 = %c0_i32 to %1 step %c1_i32  : i32 {
      %9 = arith.addi %0, %arg8 : i32
      %10 = arith.index_cast %9 : i32 to index
      %11 = memref.load %arg1[%10] : memref<256xi32, #tpu.memory_space<smem>>
      %12 = arith.addi %0, %arg8 : i32
      %13 = arith.index_cast %12 : i32 to index
      %14 = memref.load %arg2[%13] : memref<256xi32, #tpu.memory_space<smem>>
      %15 = arith.index_cast %11 : i32 to index
      %c0_7 = arith.constant 0 : index
      %16 = vector.load %arg3[%15, %c0_7] : memref<32x128xf32, #tpu.memory_space<vmem>>, vector<1x128xf32>
      %17 = arith.index_cast %arg8 : i32 to index
      %c0_8 = arith.constant 0 : index
      %18 = vector.load %arg6[%17, %c0_8] : memref<256x128xf32, #tpu.memory_space<vmem>>, vector<1x128xf32>
      tpu.vector_store %arg6[%17, %c0_8], %16 {strides = array<i32>} : memref<256x128xf32, #tpu.memory_space<vmem>>, vector<1x128xf32>,
      %19 = arith.index_cast %14 : i32 to index
      %c0_9 = arith.constant 0 : index
      %20 = vector.load %arg4[%19, %c0_9] : memref<64x128xf32, #tpu.memory_space<vmem>>, vector<1x128xf32>
      %21 = arith.index_cast %arg8 : i32 to index
      %c0_10 = arith.constant 0 : index
      %22 = vector.load %arg7[%21, %c0_10] : memref<256x128xf32, #tpu.memory_space<vmem>>, vector<1x128xf32>
      tpu.vector_store %arg7[%21, %c0_10], %20 {strides = array<i32>} : memref<256x128xf32, #tpu.memory_space<vmem>>, vector<1x128xf32>,
    }
    %c256_i32_1 = arith.constant 256 : i32
    %c0 = arith.constant 0 : index
    %c0_2 = arith.constant 0 : index
    %2 = vector.load %arg6[%c0, %c0_2] : memref<256x128xf32, #tpu.memory_space<vmem>>, vector<256x128xf32>
    %c0_3 = arith.constant 0 : index
    %c0_4 = arith.constant 0 : index
    %3 = vector.load %arg7[%c0_3, %c0_4] : memref<256x128xf32, #tpu.memory_space<vmem>>, vector<256x128xf32>
    %4 = arith.mulf %2, %3 : vector<256x128xf32>
    %5 = tpu.transpose %4, [1, 0] : vector<256x128xf32> -> vector<128x256xf32>
    %cst = arith.constant dense<0.000000e+00> : vector<256xf32>
    %6 = vector.multi_reduction <add>, %5, %cst [0] : vector<128x256xf32> to vector<256xf32>
    %7 = vector.shape_cast %6 : vector<256xf32> to vector<1x256xf32>
    %c0_5 = arith.constant 0 : index
    %c0_6 = arith.constant 0 : index
    %8 = vector.load %arg5[%c0_5, %c0_6] : memref<1x256xf32, #tpu.memory_space<vmem>>, vector<1x256xf32>
    tpu.vector_store %arg5[%c0_5, %c0_6], %7 {strides = array<i32>} : memref<1x256xf32, #tpu.memory_space<vmem>>, vector<1x256xf32>,
    return
  }
  func.func @transform_0(%arg0: i32, %arg1: memref<256xi32, #tpu.memory_space<smem>>, %arg2: memref<256xi32, #tpu.memory_space<smem>>) -> (i32, i32) {
    %c0_i32 = arith.constant 0 : i32
    %c0_i32_0 = arith.constant 0 : i32
    %c0_i32_1 = arith.constant 0 : i32
    return %c0_i32, %c0_i32_0 : i32, i32
  }
  func.func @transform_1(%arg0: i32, %arg1: memref<256xi32, #tpu.memory_space<smem>>, %arg2: memref<256xi32, #tpu.memory_space<smem>>) -> (i32, i32) {
    %c0_i32 = arith.constant 0 : i32
    %c0_i32_0 = arith.constant 0 : i32
    %c0_i32_1 = arith.constant 0 : i32
    return %c0_i32, %c0_i32_0 : i32, i32
  }
  func.func @transform_2(%arg0: i32, %arg1: memref<256xi32, #tpu.memory_space<smem>>, %arg2: memref<256xi32, #tpu.memory_space<smem>>) -> (i32, i32) {
    %c0_i32 = arith.constant 0 : i32
    %c0_i32_0 = arith.constant 0 : i32
    return %arg0, %c0_i32 : i32, i32
  }
}

</mosaic_0001>

<bundles_post_ra>
// kernel: tpu_custom_call.1
= control target key start
LH: loop header
LB: loop body
LE: loop exit
PB: predicated region body
PF: predicated region fallthrough
CT: control target
= control target key end

     0   :  { %s522_s0 = inlined_call_operand.hbm [shape: s32[256], index: 0, kind: input, shape index: {}]   ;;  %s523_s2 = inlined_call_operand.hbm [shape: f32[32,128], index: 2, kind: input, shape index: {}]   ;;  %s524_s3 = inlined_call_operand.hbm [shape: f32[64,128], index: 3, kind: input, shape index: {}]   ;;  %s525_s4 = inlined_call_operand.hbm [shape: f32[1,256], index: 4, kind: output, shape index: {}]   ;;  %s526_s1 = inlined_call_operand.vmem [shape: s32[256], index: 1, kind: input, shape index: {}]  }
   0x1   :  { %s334_s17 = scalar_lea.hbm %s522_s0, 32 }
   0x2   :  { %p335_p0 = scmp.ne.s32.totalorder %s522_s0, %s334_s17  ;;  %p338_p1 = scmp.lt.u32.totalorder %s334_s17, %s522_s0 }
   0x4   :  { %p340_p2 = pnand %p338_p1, %p335_p0 }
   0x6   :  { %343 = shalt.err (!%p340_p2)  }
   0x7   :  { %s438_s22 = smov [#allocation5]   ;;  %s11_s27 = sshll.u32 %s526_s1, 4  ;;  %s12_s27 = int_to_ptr.vmem [resolvable:$true] %s11_s27 }
   0x8   :  { %10 = dma.hbm_to_smem %s522_s0, 32, %s438_s22, [#allocation4] }
   0x9   :  { %s344_s28 = scalar_lea.vmem %s12_s27, 32  ;;  %p349_p4 = scmp.lt.s32.totalorder %s12_s27, %s12_s27 }
   0xa   :  { %p345_p3 = scmp.ne.s32.totalorder %s12_s27, %s344_s28  ;;  %p350_p5 = scmp.lt.s32.totalorder %s344_s28, %s344_s28 }
   0xc   :  { %p351_p6 = por %p350_p5, %p349_p4 }
   0xe   :  { %p352_p7 = pnand %p351_p6, %p345_p3 }
  0x10   :  { %355 = shalt.err (!%p352_p7)  }
  0x11   :  { %s439_s29 = smov [#allocation6]  }
  0x12   :  { %14 = dma.vmem_to_smem %s12_s27, 32, %s439_s29, [#allocation4] }
  0x13   :  { %426 = dma.done.wait [#allocation4], 64 }
  0x14   :  { %427 = vsyncadd [#allocation4], 4294967232 }
  0x15   :  { %16 = sfence }
  0x16   :  { %17 = vsyncpa [#allocation8], 0 }
  0x17   :  { %18 = vsyncpa [#allocation11], 0 }
  0x18   :  { %19 = vsyncpa [#allocation9], 0  ;;  %s440_s0 = smov [#allocation7]   ;;  %s356_s6 = scalar_lea.hbm %s523_s2, 512 }
  0x19   :  { %s25_s30 = sshll.u32 %s440_s0, 4  ;;  %p357_p8 = scmp.ne.s32.totalorder %s523_s2, %s356_s6  ;;  %s26_s30 = int_to_ptr.vmem [resolvable:$true] %s25_s30 }
  0x1a   :  { %p360_p9 = scmp.lt.u32.totalorder %s356_s6, %s523_s2 }
  0x1c   :  { %p362_p10 = pnand %p360_p9, %p357_p8 }
  0x1e   :  { %365 = shalt.err (!%p362_p10)
}
  0x1f   :  { %s366_s11 = scalar_lea.vmem %s26_s30, 512  ;;  %p371_p12 = scmp.lt.s32.totalorder %s26_s30, %s26_s30 }
  0x20   :  { %p367_p11 = scmp.ne.s32.totalorder %s26_s30, %s366_s11  ;;  %p372_p13 = scmp.lt.s32.totalorder %s366_s11, %s366_s11 }
  0x22   :  { %p373_p0 = por %p372_p13, %p371_p12 }
  0x24   :  { %p374_p1 = pnand %p373_p0, %p367_p11 }
  0x26   :  { %377 = shalt.err (!%p374_p1)
}
  0x27   :  { %s441_s12 = smov 128   ;;  %s442_s13 = smov 8  }
  0x28   :  { %31 = dma.hbm_to_vmem [thread:$0]  %s523_s2, 512, %s26_s30, [#allocation8], %s441_s12, %s441_s12, %s442_s13  }
  0x29   :  { %s443_s16 = smov [#allocation10]   ;;  %s378_s20 = scalar_lea.hbm %s524_s3, 1024 }
  0x2a   :  { %s37_s17 = sshll.u32 %s443_s16, 4  ;;  %p379_p2 = scmp.ne.s32.totalorder %s524_s3, %s378_s20  ;;  %s38_s17 = int_to_ptr.vmem [resolvable:$true] %s37_s17 }
  0x2b   :  { %p382_p3 = scmp.lt.u32.totalorder %s378_s20, %s524_s3 }
  0x2d   :  { %p384_p4 = pnand %p382_p3, %p379_p2 }
  0x2f   :  { %387 = shalt.err (!%p384_p4)
}
  0x30   :  { %s388_s25 = scalar_lea.vmem %s38_s17, 1024  ;;  %p393_p6 = scmp.lt.s32.totalorder %s38_s17, %s38_s17 }
  0x31   :  { %p389_p5 = scmp.ne.s32.totalorder %s38_s17, %s388_s25  ;;  %p394_p7 = scmp.lt.s32.totalorder %s388_s25, %s388_s25 }
  0x33   :  { %p395_p8 = por %p394_p7, %p393_p6 }
  0x35   :  { %p396_p9 = pnand %p395_p8, %p389_p5 }
  0x37   :  { %399 = shalt.err (!%p396_p9)
}
  0x38   :  { %43 = dma.hbm_to_vmem [thread:$0]  %s524_s3, 1024, %s38_s17, [#allocation11], %s441_s12, %s441_s12, %s442_s13  }
  0x39   :  { %428 = dma.done.wait [#allocation8], 512  }
  0x3a   :  { %429 = vsyncadd [#allocation8], 4294966784 }
  0x3b   :  { %430 = dma.done.wait [#allocation11], 1024  }
  0x3c   :  { %431 = vsyncadd [#allocation11], 4294966272  ;;  %s434_s27 = smov 0  }
  0x3d LB: > { %s58_s28 = sld [smem:[#allocation5 + %s436_s27]]  ;;  %s62_s30 = scalar_lea.vmem [#allocation2], %s436_s27  ;;  %s436_s27 = sphi %s434_s27, %s56_s27  }
  0x3e   : > { %s59_s29 = sld [smem:[#allocation6 + %s436_s27]]  ;;  %s66_s5 = scalar_lea.vmem [#allocation3], %s436_s27 }
  0x3f   : > { %s56_s27 = sadd.s32 1, %s436_s27  }
  0x40   : > { %p53_p10 = scmp.ge.s32.totalorder %s56_s27, 256  }
  0x41   :  { %s445_s3 = smov (%p53_p10), [#allocation12]  }
  0x42   :  { %55 = sbr.rel (!%p53_p10) target bundleno = 61 (0x3d), region = 47  ;;  %s299_s6 = sshll.u32 (%p53_p10), %s445_s3, 4  ;;  %s300_s6 = int_to_ptr.vmem [resolvable:$true] %s299_s6 }
  0x43   : > { %s60_s0 = scalar_lea.vmem [#allocation7], %s58_s28  ;;  %s400_s7 = scalar_lea.vmem (%p53_p10), %s300_s6, 32 }
  0x44   : > { %v61_v0 = vld [vmem:[%s60_s0] sm:$0x1]  ;;  %s64_s1 = scalar_lea.vmem [#allocation10], %s59_s29  ;;  %p401_p11 = scmp.ne.s32.totalorder (%p53_p10), %s300_s6, %s400_s7 }
  0x45   : > { %63 = vst [vmem:[%s62_s30] sm:$0x1] %v61_v0  ;;  %v65_v1 = vld [vmem:[%s64_s1] sm:$0x1]  ;;  %p405_p12 = scmp.lt.s32.totalorder (%p53_p10), %s300_s6, %s300_s6  ;;  %p406_p13 = scmp.lt.s32.totalorder (%p53_p10), %s400_s7, %s400_s7 }
  0x46   : > { %67 = vst [vmem:[%s66_s5] sm:$0x1] %v65_v1 }
  0x47   :  { %p407_p0 = por (%p53_p10), %p406_p13, %p405_p12 }
  0x49   :  { %p408_p1 = pnand %p407_p0, %p401_p11 }
  0x4c   :  { %v84_v2 = vld [vmem:[#allocation2 + $0x80] sm:$0xff]  ;;  %v85_v7 = vld [vmem:[#allocation2 + $0x88] sm:$0xff]  ;;  %v86_v14 = vld [vmem:[#allocation2 + $0x90] sm:$0xff] }
  0x4d   :  { %v116_v3 = vld [vmem:[#allocation3 + $0x80] sm:$0xff]  ;;  %v117_v8 = vld [vmem:[#allocation3 + $0x88] sm:$0xff]  ;;  %v118_v15 = vld [vmem:[#allocation3 + $0x90] sm:$0xff] }
  0x4e   :  { %v68_v4 = vld [vmem:[#allocation2] sm:$0xff]  ;;  %v148_v5 = vmul.f32 %v116_v3, %v84_v2  ;;  %v69_v10 = vld [vmem:[#allocation2 + $0x8] sm:$0xff]  ;;  %v149_v12 = vmul.f32 %v117_v8, %v85_v7  ;;  %v70_v16 = vld [vmem:[#allocation2 + $0x10] sm:$0xff]  ;;  %v150_v18 = vmul.f32 %v118_v15, %v86_v14 }
  0x4f   :  { %v100_v6 = vld [vmem:[#allocation3] sm:$0xff]  ;;  %v101_v11 = vld [vmem:[#allocation3 + $0x8] sm:$0xff]  ;;  %v102_v17 = vld [vmem:[#allocation3 + $0x10] sm:$0xff] }
  0x50   :  { %v132_v9 = vmul.f32 %v100_v6, %v68_v4  ;;  %196 = vxpose.xlu1.b32.start [1/16] %v148_v5, 128  ;;  %v133_v13 = vmul.f32 %v101_v11, %v69_v10  ;;  %v134_v19 = vmul.f32 %v102_v17, %v70_v16  ;;  %v87_v20 = vld [vmem:[#allocation2 + $0x98] sm:$0xff]  ;;  %v88_v26 = vld [vmem:[#allocation2 + $0xa0] sm:$0xff]  ;;  %v89_v32 = vld [vmem:[#allocation2 + $0xa8] sm:$0xff] }
  0x51   :  { %v119_v21 = vld [vmem:[#allocation3 + $0x98] sm:$0xff]  ;;  %v120_v27 = vld [vmem:[#allocation3 + $0xa0] sm:$0xff]  ;;  %v121_v33 = vld [vmem:[#allocation3 + $0xa8] sm:$0xff] }
  0x52   :  { %164 = vxpose.xlu0.b32.start [1/16] %v132_v9, 128  ;;  %v71_v22 = vld [vmem:[#allocation2 + $0x18] sm:$0xff]  ;;  %v151_v24 = vmul.f32 %v119_v21, %v87_v20  ;;  %v72_v28 = vld [vmem:[#allocation2 + $0x20] sm:$0xff]  ;;  %v152_v30 = vmul.f32 %v120_v27, %v88_v26  ;;  %v73_v34 = vld [vmem:[#allocation2 + $0x28] sm:$0xff]  ;;  %v153_v36 = vmul.f32 %v121_v33, %v89_v32 }
  0x53   :  { %v103_v23 = vld [vmem:[#allocation3 + $0x18] sm:$0xff]  ;;  %v104_v29 = vld [vmem:[#allocation3 + $0x20] sm:$0xff]  ;;  %v105_v35 = vld [vmem:[#allocation3 + $0x28] sm:$0xff] }
  0x54   :  { %197 = vxpose.xlu1.b32.cont [2/16] %v149_v12, 128  ;;  %v135_v25 = vmul.f32 %v103_v23, %v71_v22  ;;  %v136_v31 = vmul.f32 %v104_v29, %v72_v28  ;;  %v137_v37 = vmul.f32 %v105_v35, %v73_v34  ;;  %v90_v38 = vld [vmem:[#allocation2 + $0xb0] sm:$0xff]  ;;  %v91_v44 = vld [vmem:[#allocation2 + $0xb8] sm:$0xff]  ;;  %v92_v50 = vld [vmem:[#allocation2 + $0xc0] sm:$0xff] }
  0x55   :  { %v122_v39 = vld [vmem:[#allocation3 + $0xb0] sm:$0xff]  ;;  %v123_v45 = vld [vmem:[#allocation3 + $0xb8] sm:$0xff]  ;;  %v124_v51 = vld [vmem:[#allocation3 + $0xc0] sm:$0xff] }
  0x56   :  { %165 = vxpose.xlu0.b32.cont [2/16] %v133_v13, 128  ;;  %v74_v40 = vld [vmem:[#allocation2 + $0x30] sm:$0xff]  ;;  %v154_v42 = vmul.f32 %v122_v39, %v90_v38  ;;  %v75_v46 = vld [vmem:[#allocation2 + $0x38] sm:$0xff]  ;;  %v155_v48 = vmul.f32 %v123_v45, %v91_v44  ;;  %v76_v52 = vld [vmem:[#allocation2 + $0x40] sm:$0xff]  ;;  %v156_v54 = vmul.f32 %v124_v51, %v92_v50 }
  0x57   :  { %v106_v41 = vld [vmem:[#allocation3 + $0x30] sm:$0xff]  ;;  %v107_v47 = vld [vmem:[#allocation3 + $0x38] sm:$0xff]  ;;  %v108_v53 = vld [vmem:[#allocation3 + $0x40] sm:$0xff] }
  0x58   :  { %198 = vxpose.xlu1.b32.cont [3/16] %v150_v18, 128  ;;  %v138_v43 = vmul.f32 %v106_v41, %v74_v40  ;;  %v139_v49 = vmul.f32 %v107_v47, %v75_v46  ;;  %v140_v55 = vmul.f32 %v108_v53, %v76_v52  ;;  %v93_v56 = vld [vmem:[#allocation2 + $0xc8] sm:$0xff]  ;;  %v94_v62 = vld [vmem:[#allocation2 + $0xd0] sm:$0xff]  ;;  %v95_v4 = vld [vmem:[#allocation2 + $0xd8] sm:$0xff] }
  0x59   :  { %v125_v57 = vld [vmem:[#allocation3 + $0xc8] sm:$0xff]  ;;  %v126_v63 = vld [vmem:[#allocation3 + $0xd0] sm:$0xff]  ;;  %v127_v5 = vld [vmem:[#allocation3 + $0xd8] sm:$0xff] }
  0x5a   :  { %166 = vxpose.xlu0.b32.cont [3/16] %v134_v19, 128  ;;  %v77_v58 = vld [vmem:[#allocation2 + $0x48] sm:$0xff]  ;;  %v157_v60 = vmul.f32 %v125_v57, %v93_v56  ;;  %v78_v0 = vld [vmem:[#allocation2 + $0x50] sm:$0xff]  ;;  %v158_v2 = vmul.f32 %v126_v63, %v94_v62  ;;  %v79_v6 = vld [vmem:[#allocation2 + $0x58] sm:$0xff]  ;;  %v159_v8 = vmul.f32 %v127_v5, %v95_v4 }
  0x5b   :  { %v109_v59 = vld [vmem:[#allocation3 + $0x48] sm:$0xff]  ;;  %v110_v1 = vld [vmem:[#allocation3 + $0x50] sm:$0xff]  ;;  %v111_v7 = vld [vmem:[#allocation3 + $0x58] sm:$0xff] }
  0x5c   :  { %199 = vxpose.xlu1.b32.cont [4/16] %v151_v24, 128  ;;  %v141_v61 = vmul.f32 %v109_v59, %v77_v58  ;;  %v142_v3 = vmul.f32 %v110_v1, %v78_v0  ;;  %v143_v9 = vmul.f32 %v111_v7, %v79_v6  ;;  %v96_v10 = vld [vmem:[#allocation2 + $0xe0] sm:$0xff]  ;;  %v97_v16 = vld [vmem:[#allocation2 + $0xe8] sm:$0xff]  ;;  %v98_v22 = vld [vmem:[#allocation2 + $0xf0] sm:$0xff] }
  0x5d   :  { %v128_v11 = vld [vmem:[#allocation3 + $0xe0] sm:$0xff]  ;;  %v129_v17 = vld [vmem:[#allocation3 + $0xe8] sm:$0xff]  ;;  %v130_v23 = vld [vmem:[#allocation3 + $0xf0] sm:$0xff] }
  0x5e   :  { %167 = vxpose.xlu0.b32.cont [4/16] %v135_v25, 128  ;;  %v80_v12 = vld [vmem:[#allocation2 + $0x60] sm:$0xff]  ;;  %v160_v14 = vmul.f32 %v128_v11, %v96_v10  ;;  %v81_v18 = vld [vmem:[#allocation2 + $0x68] sm:$0xff]  ;;  %v161_v20 = vmul.f32 %v129_v17, %v97_v16  ;;  %v82_v24 = vld [vmem:[#allocation2 + $0x70] sm:$0xff]  ;;  %v162_v26 = vmul.f32 %v130_v23, %v98_v22 }
  0x5f   :  { %v112_v13 = vld [vmem:[#allocation3 + $0x60] sm:$0xff]  ;;  %v113_v19 = vld [vmem:[#allocation3 + $0x68] sm:$0xff]  ;;  %v114_v25 = vld [vmem:[#allocation3 + $0x70] sm:$0xff] }
  0x60   :  { %200 = vxpose.xlu1.b32.cont [5/16] %v152_v30, 128  ;;  %v144_v15 = vmul.f32 %v112_v13, %v80_v12  ;;  %v145_v21 = vmul.f32 %v113_v19, %v81_v18  ;;  %v146_v27 = vmul.f32 %v114_v25, %v82_v24  ;;  %v99_v28 = vld [vmem:[#allocation2 + $0xf8] sm:$0xff] }
  0x61   :  { %v131_v29 = vld [vmem:[#allocation3 + $0xf8] sm:$0xff] }
  0x62   :  { %168 = vxpose.xlu0.b32.cont [5/16] %v136_v31, 128  ;;  %v83_v30 = vld [vmem:[#allocation2 + $0x78] sm:$0xff]  ;;  %v163_v32 = vmul.f32 %v131_v29, %v99_v28 }
  0x63   :  { %v115_v31 = vld [vmem:[#allocation3 + $0x78] sm:$0xff] }
  0x64   :  { %201 = vxpose.xlu1.b32.cont [6/16] %v153_v36, 128  ;;  %v147_v33 = vmul.f32 %v115_v31, %v83_v30 }
  0x66   :  { %169 = vxpose.xlu0.b32.cont [6/16] %v137_v37, 128 }
  0x68   :  { %202 = vxpose.xlu1.b32.cont [7/16] %v154_v42, 128 }
  0x6a   :  { %170 = vxpose.xlu0.b32.cont [7/16] %v138_v43, 128 }
  0x6c   :  { %203 = vxpose.xlu1.b32.cont [8/16] %v155_v48, 128 }
  0x6e   :  { %171 = vxpose.xlu0.b32.cont [8/16] %v139_v49, 128 }
  0x70   :  { %204 = vxpose.xlu1.b32.cont [9/16] %v156_v54, 128 }
  0x72   :  { %172 = vxpose.xlu0.b32.cont [9/16] %v140_v55, 128 }
  0x74   :  { %205 = vxpose.xlu1.b32.cont [10/16] %v157_v60, 128 }
  0x76   :  { %173 = vxpose.xlu0.b32.cont [10/16] %v141_v61, 128 }
  0x78   :  { %206 = vxpose.xlu1.b32.cont [11/16] %v158_v2, 128 }
  0x7a   :  { %174 = vxpose.xlu0.b32.cont [11/16] %v142_v3, 128 }
  0x7c   :  { %207 = vxpose.xlu1.b32.cont [12/16] %v159_v8, 128 }
  0x7e   :  { %175 = vxpose.xlu0.b32.cont [12/16] %v143_v9, 128 }
  0x80   :  { %208 = vxpose.xlu1.b32.cont [13/16] %v160_v14, 128 }
  0x82   :  { %176 = vxpose.xlu0.b32.cont [13/16] %v144_v15, 128 }
  0x84   :  { %209 = vxpose.xlu1.b32.cont [14/16] %v161_v20, 128 }
  0x86   :  { %177 = vxpose.xlu0.b32.cont [14/16] %v145_v21, 128 }
  0x88   :  { %210 = vxpose.xlu1.b32.cont [15/16] %v162_v26, 128 }
  0x8a   :  { %178 = vxpose.xlu0.b32.cont [15/16] %v146_v27, 128 }
  0x8c   :  { %211 = vxpose.xlu1.b32.end [16/16] %v163_v32, 128 }
  0x8e   :  { %179 = vxpose.xlu0.b32.end [16/16] %v147_v33, 128 }
  0xd0   :  { %v212_v34 = vpop.trf.xlu1 }
  0xd2   :  { %v180_v35 = vpop.trf.xlu0 }
  0xd4   :  { %v213_v36 = vpop.trf.xlu1 }
  0xd5   :  { %v249_v51 = vadd.f32 %v213_v36, %v212_v34  ;;  %v444_v36 = vmov 1966171168  }
  0xd6   :  { %v181_v37 = vpop.trf.xlu0 }
  0xd7   :  { %v228_v53 = vadd.f32 %v181_v37, %v180_v35  ;;  %v274_v37 = vunpack.c.l.s4 %v444_v36 }
  0xd8   :  { %v214_v38 = vpop.trf.xlu1 }
  0xd9   :  { %v250_v54 = vadd.f32 %v249_v51, %v214_v38  ;;  %v276_v38 = vlaneseq }
  0xda   :  { %v182_v39 = vpop.trf.xlu0 }
  0xdb   :  { %v229_v55 = vadd.f32 %v228_v53, %v182_v39  ;;  %vm290_vm0 = vcmp.lt.s32.totalorder %v276_v38, 256 }
  0xdc   :  { %v215_v40 = vpop.trf.xlu1 }
  0xdd   :  { %v251_v57 = vadd.f32 %v250_v54, %v215_v40 }
  0xde   :  { %v183_v41 = vpop.trf.xlu0 }
  0xdf   :  { %v230_v59 = vadd.f32 %v229_v55, %v183_v41 }
  0xe0   :  { %v216_v42 = vpop.trf.xlu1 }
  0xe1   :  { %v252_v60 = vadd.f32 %v251_v57, %v216_v42 }
  0xe2   :  { %v184_v43 = vpop.trf.xlu0 }
  0xe3   :  { %v231_v61 = vadd.f32 %v230_v59, %v184_v43  ;;  %v275_v43 = vunpack.c.0.s8 %v274_v37 }
  0xe4   :  { %v217_v44 = vpop.trf.xlu1 }
  0xe5   :  { %v253_v63 = vadd.f32 %v252_v60, %v217_v44  ;;  %v277_v44 = vshrl.u32 %v276_v38, 7 }
  0xe6   :  { %v185_v45 = vpop.trf.xlu0 }
  0xe7   :  { %v232_v1 = vadd.f32 %v231_v61, %v185_v45 }
  0xe8   :  { %v218_v46 = vpop.trf.xlu1 }
  0xe9   :  { %v254_v2 = vadd.f32 %v253_v63, %v218_v46 }
  0xea   :  { %v186_v47 = vpop.trf.xlu0 }
  0xeb   :  { %v233_v3 = vadd.f32 %v232_v1, %v186_v47 }
  0xec   :  { %v219_v48 = vpop.trf.xlu1 }
  0xed   :  { %v255_v5 = vadd.f32 %v254_v2, %v219_v48 }
  0xee   :  { %v187_v49 = vpop.trf.xlu0 }
  0xef   :  { %v234_v7 = vadd.f32 %v233_v3, %v187_v49  ;;  %v278_v49 = vsub.s32 %v275_v43, %v277_v44 }
  0xf0   :  { %v220_v50 = vpop.trf.xlu1 }
  0xf1   :  { %v256_v8 = vadd.f32 %v255_v5, %v220_v50 }
  0xf2   :  { %v188_v52 = vpop.trf.xlu0 }
  0xf3   :  { %v235_v9 = vadd.f32 %v234_v7, %v188_v52 }
  0xf4   :  { %v221_v56 = vpop.trf.xlu1 }
  0xf5   :  { %v257_v11 = vadd.f32 %v256_v8, %v221_v56 }
  0xf6   :  { %v189_v58 = vpop.trf.xlu0 }
  0xf7   :  { %v236_v13 = vadd.f32 %v235_v9, %v189_v58 }
  0xf8   :  { %v222_v62 = vpop.trf.xlu1 }
  0xf9   :  { %v258_v14 = vadd.f32 %v257_v11, %v222_v62 }
  0xfa   :  { %v190_v0 = vpop.trf.xlu0 }
  0xfb   :  { %v237_v15 = vadd.f32 %v236_v13, %v190_v0 }
  0xfc   :  { %v223_v4 = vpop.trf.xlu1 }
  0xfd   :  { %v259_v17 = vadd.f32 %v258_v14, %v223_v4 }
  0xfe   :  { %v191_v6 = vpop.trf.xlu0 }
  0xff   :  { %v238_v19 = vadd.f32 %v237_v15, %v191_v6 }
 0x100   :  { %v224_v10 = vpop.trf.xlu1 }
 0x101   :  { %v260_v20 = vadd.f32 %v259_v17, %v224_v10 }
 0x102   :  { %v192_v12 = vpop.trf.xlu0 }
 0x103   :  { %v239_v21 = vadd.f32 %v238_v19, %v192_v12 }
 0x104   :  { %v225_v16 = vpop.trf.xlu1 }
 0x105   :  { %v261_v23 = vadd.f32 %v260_v20, %v225_v16 }
 0x106   :  { %v193_v18 = vpop.trf.xlu0 }
 0x107   :  { %v240_v25 = vadd.f32 %v239_v21, %v193_v18 }
 0x108   :  { %v226_v22 = vpop.trf.xlu1 }
 0x109   :  { %v262_v26 = vadd.f32 %v261_v23, %v226_v22 }
 0x10a   :  { %v194_v24 = vpop.trf.xlu0 }
 0x10b   :  { %v241_v27 = vadd.f32 %v240_v25, %v194_v24 }
 0x10c   :  { %v227_v28 = vpop.trf.xlu1 }
 0x10d   :  { %v263_v29 = vadd.f32 %v262_v26, %v227_v28 }
 0x10e   :  { %v195_v30 = vpop.trf.xlu0 }
 0x10f   :  { %v242_v31 = vadd.f32 %v241_v27, %v195_v30  ;;  %v264_v32 = vrot.slane %v263_v29, 4 }
 0x111   :  { %v243_v33 = vrot.slane %v242_v31, 4  ;;  %v265_v34 = vadd.f32 %v264_v32, %v263_v29 }
 0x113   :  { %v244_v35 = vadd.f32 %v243_v33, %v242_v31  ;;  %v266_v39 = vrot.slane %v265_v34, 2 }
 0x115   :  { %v245_v40 = vrot.slane %v244_v35, 2  ;;  %v267_v41 = vadd.f32 %v266_v39, %v265_v34 }
 0x117   :  { %v246_v42 = vadd.f32 %v245_v40, %v244_v35  ;;  %v268_v45 = vrot.slane %v267_v41, 1 }
 0x119   :  { %v247_v46 = vrot.slane %v246_v42, 1  ;;  %v269_v47 = vadd.f32 %v268_v45, %v267_v41 }
 0x11b   :  { %v248_v48 = vadd.f32 %v247_v46, %v246_v42 }
 0x11d   :  { %v272_v50 = vcombine.low %v248_v48, %v269_v47 }
 0x11f   :  { %v279_v51 = vrot.slane %v272_v50, %v278_v49 }
 0x121   :  { %v286_v52 = vrot.slane %v279_v51, %v278_v49 }
 0x123   :  { %292 = vst.msk [vmem:[#allocation12] sm:$0x3] %vm290_vm0, %v286_v52 }
 0x124   :  { %411 = shalt.err (!%p408_p1)
}
 0x125   :  { %s412_s10 = scalar_lea.hbm %s525_s4, 32 }
 0x126   :  { %p413_p2 = scmp.ne.s32.totalorder %s525_s4, %s412_s10  ;;  %p416_p3 = scmp.lt.u32.totalorder %s412_s10, %s525_s4 }
 0x128   :  { %p418_p4 = pnand %p416_p3, %p413_p2 }
 0x12a   :  { %421 = shalt.err (!%p418_p4)
}
 0x12b   :  { %302 = dma.vmem_to_hbm [thread:$0]  %s300_s6, 32, %s525_s4, [#allocation9]  }
 0x12c   :  { %432 = dma.done.wait [#allocation9], 32  }
 0x12d   :  { %433 = vsyncadd [#allocation9], 4294967264 }
 0x12e   :  { %306 = vsyncpa [#allocation8], 1 }
 0x12f   :  { %307 = vsyncpa [#allocation11], 1 }
 0x130   :  { %308 = vsyncpa [#allocation9], 1 }

</bundles_post_ra>
